<compile_context>
chip_gen: v7x
topology: tpu7x:2x2x1
jax: 0.10.0
libtpu: 0.0.40
codegen_flags: <defaults>
</compile_context>

<pallas_src>
import functools

import jax
import jax.numpy as jnp
from jax.experimental import pallas as pl
from jax.experimental.pallas import tpu as pltpu

D_IN, H1, H2, D_OUT = 33, 15, 8, 1


def mlp_kernel(x_ref, w1_ref, b1_ref, w2_ref, b2_ref, w3_ref, b3_ref, o_ref):
    """Whole 3-layer MLP fused on one (block_b, D_IN) batch tile.

    The batch tile is transposed once (XLU) so all activations are lane-dense
    with batch in the lane dimension; the output is written as a (1, block_b)
    row (lane-dense store, contiguous writeback DMA).
    Weights are PyTorch layout (out, in); biases are (out, 1) columns.
    """
    x_t = jnp.transpose(x_ref[...])                                # (D_IN, bb)

    h1 = jnp.dot(w1_ref[...], x_t, preferred_element_type=jnp.float32)
    h1 = jnp.maximum(h1 + b1_ref[...], 0.0)                        # (H1, bb)

    h2 = jnp.dot(w2_ref[...], h1, preferred_element_type=jnp.float32)
    h2 = jnp.maximum(h2 + b2_ref[...], 0.0)                        # (H2, bb)

    z3 = jnp.dot(w3_ref[...], h2, preferred_element_type=jnp.float32)
    z3 = z3 + b3_ref[...]                                          # (1, bb)

    # sigmoid(z) = 1 / (1 + exp(-z)); exp goes to the EUP slot, reciprocal
    # stays exact so numerics match the f32 reference.
    o_ref[...] = pl.reciprocal(1.0 + jnp.exp(-z3), approx=False).astype(o_ref.dtype)


def _round_up(x, m):
    return (x + m - 1) // m * m


@functools.partial(jax.jit, static_argnames=("block_b",))
def _mlp_pallas(x, w1, b1, w2, b2, w3, b3, *, block_b):
    B = x.shape[0]
    assert B % block_b == 0, "caller pads the batch to a multiple of block_b"
    grid = (B // block_b,)

    # Small params: full-array blocks with a constant index_map -> they stay
    # resident in VMEM across grid steps (no re-DMA per step).
    full = lambda a: pl.BlockSpec(a.shape, lambda i: (0,) * a.ndim)

    return pl.pallas_call(
        mlp_kernel,
        # Lane-dense output: one row of length B; wrapper reshapes to (B, 1).
        out_shape=jax.ShapeDtypeStruct((D_OUT, B), x.dtype),
        grid_spec=pltpu.PrefetchScalarGridSpec(
            num_scalar_prefetch=0,
            grid=grid,
            in_specs=[
                pl.BlockSpec((block_b, D_IN), lambda i: (i, 0)),
                full(w1), full(b1), full(w2), full(b2), full(w3), full(b3),
            ],
            out_specs=pl.BlockSpec((D_OUT, block_b), lambda i: (0, i)),
        ),
        compiler_params=pltpu.CompilerParams(
            dimension_semantics=("parallel",),     # megacore-shardable on v7x
            vmem_limit_bytes=32 * 1024 * 1024,     # explicit budget; ~3 MiB used at bb=2048
        ),
    )(x, w1, b1, w2, b2, w3, b3)


def mlp_forward(x, params, max_block_b=2048):
    """Run the fused MLP on x of shape (B, 33); returns (B, 1)."""
    w1, b1, w2, b2, w3, b3 = params
    B = x.shape[0]

    # Aim for >= ~8 grid steps on large batches (>= 4 per TC on v7x), while
    # keeping blocks big enough to amortize the ~0.35us per-step overhead.
    # Always a multiple of 128 so the lane-dense output block obeys the
    # (8, 128) layout rule; capped so VMEM stays well under the v5e 16 MiB
    # scoped default and v7x 64 MiB physical.
    bb = _round_up(pl.cdiv(B, 16), 128)
    bb = max(512, min(bb, int(max_block_b)))
    bb = min(bb, _round_up(B, 128))

    # Zero-pad the batch to a multiple of block_b: no ragged blocks, no
    # garbage rows feeding exp(). No-op copy when B already divides.
    B_pad = _round_up(B, bb)
    x_in = x if B_pad == B else jnp.pad(x, ((0, B_pad - B), (0, 0)))

    out_row = _mlp_pallas(
        x_in, w1, b1.reshape(-1, 1), w2, b2.reshape(-1, 1), w3, b3.reshape(-1, 1),
        block_b=bb)                                   # (1, B_pad)
    # (1, B) -> (B, 1): same contiguous layout, free reshape.
    return out_row[:, :B].reshape(B, D_OUT)


def init_params(key):
    """Init mirroring the module (PyTorch layout: W is (out, in), b is (out,)):
    kaiming_uniform_(nonlinearity='relu') on the first two weights,
    xavier_uniform_ on the third, Linear-default uniform biases."""
    ks = jax.random.split(key, 6)

    def kaiming_uniform_relu(k, out_f, in_f):
        bound = jnp.sqrt(2.0) * jnp.sqrt(3.0 / in_f)      # gain=sqrt(2) for relu
        return jax.random.uniform(k, (out_f, in_f), jnp.float32, -bound, bound)

    def xavier_uniform(k, out_f, in_f):
        bound = jnp.sqrt(6.0 / (in_f + out_f))
        return jax.random.uniform(k, (out_f, in_f), jnp.float32, -bound, bound)

    def linear_bias(k, out_f, in_f):
        bound = 1.0 / jnp.sqrt(in_f)
        return jax.random.uniform(k, (out_f,), jnp.float32, -bound, bound)

    w1 = kaiming_uniform_relu(ks[0], H1, D_IN)
    b1 = linear_bias(ks[1], H1, D_IN)
    w2 = kaiming_uniform_relu(ks[2], H2, H1)
    b2 = linear_bias(ks[3], H2, H1)
    w3 = xavier_uniform(ks[4], D_OUT, H2)
    b3 = linear_bias(ks[5], D_OUT, H2)
    return (w1, b1, w2, b2, w3, b3)


def mlp_reference(x, params):
    w1, b1, w2, b2, w3, b3 = params
    h1 = jnp.maximum(x @ w1.T + b1, 0.0)
    h2 = jnp.maximum(h1 @ w2.T + b2, 0.0)
    return jax.nn.sigmoid(h2 @ w3.T + b3)


if __name__ == "__main__":
    key = jax.random.PRNGKey(0)
    kx, kp = jax.random.split(key)
    params = init_params(kp)

    # Main check: B=4096 -> block_b=512 -> grid of 8 "parallel" steps
    # (>= 4 per TensorCore on v7x so DMA/compute actually overlap).
    B = 4096
    x = jax.random.normal(kx, (B, D_IN), jnp.float32)
    out = mlp_forward(x, params)
    jax.block_until_ready(out)
    ref = mlp_reference(x, params)
    assert out.shape == (B, D_OUT)
    assert jnp.allclose(out, ref, atol=1e-5, rtol=1e-5)

    # Tiny and non-multiple batches: exercise the block_b clamp / zero-pad path.
    for b_small in (8, 777):
        xs = jax.random.normal(jax.random.PRNGKey(b_small), (b_small, D_IN), jnp.float32)
        outs = mlp_forward(xs, params)
        jax.block_until_ready(outs)
        assert outs.shape == (b_small, D_OUT)
        assert jnp.allclose(outs, mlp_reference(xs, params), atol=1e-5, rtol=1e-5)

    print("KERNEL_OK")
</pallas_src>

<mosaic_0001>
module attributes {stable_mosaic.version = 11 : i64} {
  func.func @mlp_kernel(%arg0: i32, %arg1: memref<512x33xf32, #tpu.memory_space<vmem>>, %arg2: memref<15x33xf32, #tpu.memory_space<vmem>>, %arg3: memref<15x1xf32, #tpu.memory_space<vmem>>, %arg4: memref<8x15xf32, #tpu.memory_space<vmem>>, %arg5: memref<8x1xf32, #tpu.memory_space<vmem>>, %arg6: memref<1x8xf32, #tpu.memory_space<vmem>>, %arg7: memref<1x1xf32, #tpu.memory_space<vmem>>, %arg8: memref<1x512xf32, #tpu.memory_space<vmem>>) attributes {dimension_semantics = [#tpu.dimension_semantics<parallel>], iteration_bounds = array<i64: 8>, scalar_prefetch = 0 : i64, scratch_operands = 0 : i64, tpu.core_type = #tpu.core_type<tc>, window_params = [{transform_indices = @transform_0, window_bounds = array<i64: 512, 33>}, {pipeline_mode = #tpu.pipeline_mode<synchronous>, transform_indices = @transform_1, window_bounds = array<i64: 15, 33>}, {pipeline_mode = #tpu.pipeline_mode<synchronous>, transform_indices = @transform_2, window_bounds = array<i64: 15, 1>}, {pipeline_mode = #tpu.pipeline_mode<synchronous>, transform_indices = @transform_3, window_bounds = array<i64: 8, 15>}, {pipeline_mode = #tpu.pipeline_mode<synchronous>, transform_indices = @transform_4, window_bounds = array<i64: 8, 1>}, {pipeline_mode = #tpu.pipeline_mode<synchronous>, transform_indices = @transform_5, window_bounds = array<i64: 1, 8>}, {pipeline_mode = #tpu.pipeline_mode<synchronous>, transform_indices = @transform_6, window_bounds = array<i64: 1, 1>}, {transform_indices = @transform_7, window_bounds = array<i64: 1, 512>}]} {
    %c0 = arith.constant 0 : index
    %c0_0 = arith.constant 0 : index
    %0 = vector.load %arg1[%c0, %c0_0] : memref<512x33xf32, #tpu.memory_space<vmem>>, vector<512x33xf32>
    %1 = tpu.transpose %0, [1, 0] : vector<512x33xf32> -> vector<33x512xf32>
    %c0_1 = arith.constant 0 : index
    %c0_2 = arith.constant 0 : index
    %2 = vector.load %arg2[%c0_1, %c0_2] : memref<15x33xf32, #tpu.memory_space<vmem>>, vector<15x33xf32>
    %cst = arith.constant dense<0.000000e+00> : vector<15x512xf32>
    %3 = tpu.matmul %2, %1, %cst {dimension_numbers = #tpu.dot_dimension_numbers<[1], [0], [0], [1], [0, 0, 1, 1], [], []>} : vector<15x33xf32>, vector<33x512xf32>, vector<15x512xf32> -> vector<15x512xf32>
    %c0_3 = arith.constant 0 : index
    %c0_4 = arith.constant 0 : index
    %4 = vector.load %arg3[%c0_3, %c0_4] : memref<15x1xf32, #tpu.memory_space<vmem>>, vector<15x1xf32>
    %5 = vector.broadcast %4 : vector<15x1xf32> to vector<15x512xf32>
    %6 = arith.addf %3, %5 : vector<15x512xf32>
    %cst_5 = arith.constant 0.000000e+00 : f32
    %7 = vector.broadcast %cst_5 : f32 to vector<15x512xf32>
    %8 = arith.maximumf %6, %7 : vector<15x512xf32>
    %c0_6 = arith.constant 0 : index
    %c0_7 = arith.constant 0 : index
    %9 = vector.load %arg4[%c0_6, %c0_7] : memref<8x15xf32, #tpu.memory_space<vmem>>, vector<8x15xf32>
    %cst_8 = arith.constant dense<0.000000e+00> : vector<8x512xf32>
    %10 = tpu.matmul %9, %8, %cst_8 {dimension_numbers = #tpu.dot_dimension_numbers<[1], [0], [0], [1], [0, 0, 1, 1], [], []>} : vector<8x15xf32>, vector<15x512xf32>, vector<8x512xf32> -> vector<8x512xf32>
    %c0_9 = arith.constant 0 : index
    %c0_10 = arith.constant 0 : index
    %11 = vector.load %arg5[%c0_9, %c0_10] : memref<8x1xf32, #tpu.memory_space<vmem>>, vector<8x1xf32>
    %12 = vector.broadcast %11 : vector<8x1xf32> to vector<8x512xf32>
    %13 = arith.addf %10, %12 : vector<8x512xf32>
    %cst_11 = arith.constant 0.000000e+00 : f32
    %14 = vector.broadcast %cst_11 : f32 to vector<8x512xf32>
    %15 = arith.maximumf %13, %14 : vector<8x512xf32>
    %c0_12 = arith.constant 0 : index
    %c0_13 = arith.constant 0 : index
    %16 = vector.load %arg6[%c0_12, %c0_13] : memref<1x8xf32, #tpu.memory_space<vmem>>, vector<1x8xf32>
    %cst_14 = arith.constant dense<0.000000e+00> : vector<1x512xf32>
    %17 = tpu.matmul %16, %15, %cst_14 {dimension_numbers = #tpu.dot_dimension_numbers<[1], [0], [0], [1], [0, 0, 1, 1], [], []>} : vector<1x8xf32>, vector<8x512xf32>, vector<1x512xf32> -> vector<1x512xf32>
    %c0_15 = arith.constant 0 : index
    %c0_16 = arith.constant 0 : index
    %18 = vector.load %arg7[%c0_15, %c0_16] : memref<1x1xf32, #tpu.memory_space<vmem>>, vector<1x1xf32>
    %19 = vector.broadcast %18 : vector<1x1xf32> to vector<1x512xf32>
    %20 = arith.addf %17, %19 : vector<1x512xf32>
    %cst_17 = arith.constant 0.000000e+00 : f32
    %21 = vector.broadcast %cst_17 : f32 to vector<1x512xf32>
    %22 = arith.subf %21, %20 : vector<1x512xf32>
    %23 = math.exp %22 : vector<1x512xf32>
    %cst_18 = arith.constant 1.000000e+00 : f32
    %24 = vector.broadcast %cst_18 : f32 to vector<1x512xf32>
    %25 = arith.addf %24, %23 : vector<1x512xf32>
    %26 = tpu.reciprocal %25 : vector<1x512xf32> -> vector<1x512xf32>
    %c0_19 = arith.constant 0 : index
    %c0_20 = arith.constant 0 : index
    %27 = vector.load %arg8[%c0_19, %c0_20] : memref<1x512xf32, #tpu.memory_space<vmem>>, vector<1x512xf32>
    tpu.vector_store %arg8[%c0_19, %c0_20], %26 {strides = array<i32>} : memref<1x512xf32, #tpu.memory_space<vmem>>, vector<1x512xf32>,
    return
  }
  func.func @transform_0(%arg0: i32) -> (i32, i32) {
    %c0_i32 = arith.constant 0 : i32
    %c0_i32_0 = arith.constant 0 : i32
    return %arg0, %c0_i32 : i32, i32
  }
  func.func @transform_1(%arg0: i32) -> (i32, i32) {
    %c0_i32 = arith.constant 0 : i32
    %c0_i32_0 = arith.constant 0 : i32
    %c0_i32_1 = arith.constant 0 : i32
    return %c0_i32, %c0_i32_0 : i32, i32
  }
  func.func @transform_2(%arg0: i32) -> (i32, i32) {
    %c0_i32 = arith.constant 0 : i32
    %c0_i32_0 = arith.constant 0 : i32
    %c0_i32_1 = arith.constant 0 : i32
    return %c0_i32, %c0_i32_0 : i32, i32
  }
  func.func @transform_3(%arg0: i32) -> (i32, i32) {
    %c0_i32 = arith.constant 0 : i32
    %c0_i32_0 = arith.constant 0 : i32
    %c0_i32_1 = arith.constant 0 : i32
    return %c0_i32, %c0_i32_0 : i32, i32
  }
  func.func @transform_4(%arg0: i32) -> (i32, i32) {
    %c0_i32 = arith.constant 0 : i32
    %c0_i32_0 = arith.constant 0 : i32
    %c0_i32_1 = arith.constant 0 : i32
    return %c0_i32, %c0_i32_0 : i32, i32
  }
  func.func @transform_5(%arg0: i32) -> (i32, i32) {
    %c0_i32 = arith.constant 0 : i32
    %c0_i32_0 = arith.constant 0 : i32
    %c0_i32_1 = arith.constant 0 : i32
    return %c0_i32, %c0_i32_0 : i32, i32
  }
  func.func @transform_6(%arg0: i32) -> (i32, i32) {
    %c0_i32 = arith.constant 0 : i32
    %c0_i32_0 = arith.constant 0 : i32
    %c0_i32_1 = arith.constant 0 : i32
    return %c0_i32, %c0_i32_0 : i32, i32
  }
  func.func @transform_7(%arg0: i32) -> (i32, i32) {
    %c0_i32 = arith.constant 0 : i32
    %c0_i32_0 = arith.constant 0 : i32
    return %c0_i32, %arg0 : i32, i32
  }
}

</mosaic_0001>

<bundles_post_ra>
// kernel: _mlp_pallas.1
= control target key start
LH: loop header
LB: loop body
LE: loop exit
PB: predicated region body
PF: predicated region fallthrough
CT: control target
= control target key end

     0   :  { %s1888_s0 = inlined_call_operand.vmem [shape: f32[4096,33], index: 0, kind: input, shape index: {}]   ;;  %s1889_s1 = inlined_call_operand.vmem [shape: f32[15,33], index: 1, kind: input, shape index: {}]   ;;  %s1890_s2 = inlined_call_operand.vmem [shape: f32[15,1], index: 2, kind: input, shape index: {}]   ;;  %s1891_s3 = inlined_call_operand.vmem [shape: f32[8,15], index: 3, kind: input, shape index: {}]   ;;  %s1892_s4 = inlined_call_operand.vmem [shape: f32[8,1], index: 4, kind: input, shape index: {}]   ;;  %s1893_s5 = inlined_call_operand.vmem [shape: f32[1,8], index: 5, kind: input, shape index: {}]   ;;  %s1894_s6 = inlined_call_operand.<no memory space> [shape: f32[1,1], index: 6, kind: input, shape index: {}]   ;;  %s1895_s7 = inlined_call_operand.hbm [shape: f32[1,4096], index: 7, kind: output, shape index: {}]  }
   0x1   :  { %v12_v0 = vstv %s1894_s6 }
   0x2   :  { %13 = vst [vmem:[#allocation2] sm:$0x1] %v12_v0 }
   0x3   :  { %14 = vsyncpa [#allocation4], 0 }
   0x4   :  { %16 = vsyncpa [#allocation4 + $0x1], 0  ;;  %s1618_s26 = smov 0   ;;  %s1620_s27 = smov 0  }
   0x5   :  { %s1622_s28 = smov 0   ;;  %s1624_s29 = smov 0  }
   0x6 LB: > { %s1175_s6 = sadd.s32 4294967295, %s1568_s29   ;;  %s1176_s30 = sadd.s32 4294967294, %s1568_s29   ;;  %s1568_s29 = sphi %s1624_s29, %s1903_s29   ;;  %s1564_s28 = sphi %s1622_s28, %s1902_s28   ;;  %s1560_s27 = sphi %s1620_s27, %s1901_s27   ;;  %s1556_s26 = sphi %s1618_s26, %s1900_s26  }
   0x7   : > { %s1641_s8 = sadd.s32 1, %s1568_s29   ;;  %s181_s9 = sadd.s32 1, %s1564_s28 }
   0x8   : > { %s178_s10 = ssub.s32 %s1568_s29, %s1641_s8  ;;  %p191_p0 = scmp.ne.s32.totalorder %s1564_s28, %s1560_s27 }
   0x9   : > { %p179_p1 = scmp.eq.s32.totalorder %s178_s10, 0  ;;  %p192_p2 = scmp.eq.s32.totalorder %s1175_s6, 7 }
   0xa   : > { %p197_p3 = scmp.ne.s32.totalorder %s1560_s27, %s1556_s26  ;;  %p198_p4 = scmp.eq.s32.totalorder %s1176_s30, 7 }
   0xb   : > { %s1651_s11 = scalar_select %p179_p1, %s1564_s28, %s181_s9  }
   0xc   : > { %p1653_p5 = por %p192_p2, %p191_p0  ;;  %p1657_p6 = por %p198_p4, %p197_p3 }
   0xd   : > { %p1179_p7 = scmp.ge.s32.totalorder %s1568_s29, 1  ;;  %p243_p8 = scmp.lt.s32.totalorder %s1568_s29, 9 }
   0xf   : > { %p244_p9 = pnand %p1179_p7, %p243_p8 }
  0x10   : > { %s1663_s14 = sshll.u32 (!%p244_p9), %s1175_s6, 6  ;;  %vm360_vm0 = vcmask (!%p244_p9), 269312   ;;  %v1668_v1 = vld [vmem:[%s1889_s1] sm:$0xff] (!%p244_p9)  ;;  %v1570_v3 = vmov (!%p244_p9), 0   ;;  %v349_v4 = vld [vmem:[%s1890_s2 + $0x8] sm:$0x7f] (!%p244_p9) }
  0x11   : > { %247 = sbr.rel (%p244_p9) target bundleno = 809 (0x329), region = 48  ;;  %p276_p10 = scmp.lt.s32.totalorder (!%p244_p9), %s1663_s14, 511  ;;  %1297 = vmatprep.mubr.msk.f32.mxu0 (!%p244_p9), %vm360_vm0, %v1668_v1  ;;  %1333 = vmatprep.mubr.msk.f32.mxu1 (!%p244_p9), %vm360_vm0, %v1668_v1  ;;  %v348_v2 = vld [vmem:[%s1890_s2] sm:$0xff] (!%p244_p9)  ;;  %vm1689_vm1 = vmpackc.low (!%p244_p9), %vm360_vm0, %vm360_vm0  ;;  %v1571_v5 = vmov (!%p244_p9), 0.0   ;;  %vm732_vm2 = vcmask (!%p244_p9), 1046528   ;;  %vm1572_vm3 = vmmov (!%p244_p9), 1  }
  0x12   : > { %1488 = vset.pattern.permute.xlu0 (!%p244_p9), %v1570_v3  ;;  %1489 = vset.pattern.permute.xlu1 (!%p244_p9), %v1570_v3  ;;  %vm1434_vm4 = vmpackc.low (!%p244_p9), %vm732_vm2, %vm1572_vm3  ;;  %vm728_vm5 = vcmask (!%p244_p9), 121856   ;;  %vm902_vm6 = vcmask (!%p244_p9), 64512   ;;  %s1574_s9 = smov (!%p244_p9), [#allocation3]  }
  0x13   : > { %352 = vperm.xlu0 (!%p244_p9), %1488, %v348_v2   ;;  %s1510_s10 = sshll.u32 (!%p244_p9), %s1574_s9, 4  ;;  %s1511_s10 = int_to_ptr.vmem [resolvable:$false] %s1510_s10 }
  0x14   : > { %s1512_s15 = scalar_lea.vmem (!%p244_p9), %s1511_s10, 128 }
  0x17   : > { %357 = vperm.xlu0 (!%p244_p9), %1488, %v349_v4  }
  0x18   : > { %s277_s19 = scalar_select %p276_p10, %s1663_s14, 511 }
  0x1a   : > { %s1182_s22 = sshll.u32 %s277_s19, 3  ;;  %s272_s19 = sand.u32 1, %s1560_s27  }
  0x1b   : > { %s1685_s25 = scalar_lea.vmem %s1888_s0, %s1182_s22  ;;  %s1180_s20 = sshll.u32 %s272_s19, 2 }
  0x1c   : > { %v298_v6 = vld [vmem:[%s1685_s25 + $0x80] sm:$0xff]  ;;  %v299_v7 = vld [vmem:[%s1685_s25 + $0x88] sm:$0xff]  ;;  %v300_v17 = vld [vmem:[%s1685_s25 + $0x90] sm:$0xff]  ;;  %s274_s21 = scalar_lea.vmem [#allocation3], %s1180_s20  ;;  %s1103_s6 = scalar_lea.sflag [#allocation4], %s272_s19 }
  0x1d   : > { %v330_v8 = vld [vmem:[%s1685_s25 + $0x180] sm:$0xff]  ;;  %v1337_v9 = vpack.c.bf16 %v299_v7, %v298_v6  ;;  %v331_v10 = vld [vmem:[%s1685_s25 + $0x188] sm:$0xff]  ;;  %v301_v19 = vld [vmem:[%s1685_s25 + $0x98] sm:$0xff]  ;;  %s1117_s22 = sshll.u32 %s274_s21, 4  ;;  %s1848_s22 = int_to_ptr.vmem [resolvable:$true] %s1117_s22 }
  0x1e   : > { %v282_v11 = vld [vmem:[%s1685_s25] sm:$0xff]  ;;  %v283_v12 = vld [vmem:[%s1685_s25 + $0x8] sm:$0xff]  ;;  %v1385_v13 = vpack.c.bf16 %v331_v10, %v330_v8  ;;  %v332_v20 = vld [vmem:[%s1685_s25 + $0x190] sm:$0xff]  ;;  %v1343_v22 = vpack.c.bf16 %v301_v19, %v300_v17  ;;  %s1506_s30 = scalar_lea.vmem %s1848_s22, 64  ;;  %p1513_p0 = scmp.lt.s32.totalorder %s1848_s22, %s1511_s10 }
  0x1f   : > { %v1340_v14 = vpack.c.bf16 %v283_v12, %v282_v11  ;;  %v314_v15 = vld [vmem:[%s1685_s25 + $0x100] sm:$0xff]  ;;  %v315_v16 = vld [vmem:[%s1685_s25 + $0x108] sm:$0xff]  ;;  %1339 = vmatprep.subr.msk.bf16.mxu0 %vm1689_vm1, %v1337_v9  ;;  %v333_v21 = vld [vmem:[%s1685_s25 + $0x198] sm:$0xff]  ;;  %p1507_p11 = scmp.ne.s32.totalorder %s1848_s22, %s1506_s30  ;;  %p1514_p1 = scmp.lt.s32.totalorder %s1512_s15, %s1506_s30 }
  0x20   : > { %v1388_v18 = vpack.c.bf16 %v315_v16, %v314_v15  ;;  %1387 = vmatprep.subr.msk.bf16.mxu1 %vm1689_vm1, %v1385_v13  ;;  %v1391_v23 = vpack.c.bf16 %v333_v21, %v332_v20  ;;  %v284_v24 = vld [vmem:[%s1685_s25 + $0x10] sm:$0xff]  ;;  %v285_v25 = vld [vmem:[%s1685_s25 + $0x18] sm:$0xff]  ;;  %v302_v28 = vld [vmem:[%s1685_s25 + $0xa0] sm:$0xff] }
  0x21   : > { %1342 = vmatpush3.bf16.xpose.msk.msra.mxu0 %vm1689_vm1, %v1340_v14  ;;  %v316_v26 = vld [vmem:[%s1685_s25 + $0x110] sm:$0xff]  ;;  %v317_v27 = vld [vmem:[%s1685_s25 + $0x118] sm:$0xff]  ;;  %v303_v29 = vld [vmem:[%s1685_s25 + $0xa8] sm:$0xff]  ;;  %v1346_v32 = vpack.c.bf16 %v285_v25, %v284_v24  ;;  %p1508_p12 = pnand %p1507_p11, %p1653_p5  ;;  %p1515_p2 = por %p1514_p1, %p1513_p0 }
  0x22   : > { %1390 = vmatpush3.bf16.xpose.msk.msra.mxu1 %vm1689_vm1, %v1388_v18  ;;  %1345 = vmatprep.subr.msk.bf16.mxu0 %vm1689_vm1, %v1343_v22  ;;  %v334_v30 = vld [vmem:[%s1685_s25 + $0x1a0] sm:$0xff]  ;;  %v335_v31 = vld [vmem:[%s1685_s25 + $0x1a8] sm:$0xff]  ;;  %v1394_v33 = vpack.c.bf16 %v317_v27, %v316_v26  ;;  %v1349_v34 = vpack.c.bf16 %v303_v29, %v302_v28  ;;  %v304_v40 = vld [vmem:[%s1685_s25 + $0xb0] sm:$0xff] }
  0x23   : > { %1393 = vmatprep.subr.msk.bf16.mxu1 %vm1689_vm1, %v1391_v23  ;;  %v1397_v35 = vpack.c.bf16 %v335_v31, %v334_v30  ;;  %v286_v36 = vld [vmem:[%s1685_s25 + $0x20] sm:$0xff]  ;;  %v287_v37 = vld [vmem:[%s1685_s25 + $0x28] sm:$0xff]  ;;  %v305_v41 = vld [vmem:[%s1685_s25 + $0xb8] sm:$0xff]  ;;  %p1509_p13 = pneg %p1508_p12 }
  0x24   : > { %v318_v38 = vld [vmem:[%s1685_s25 + $0x120] sm:$0xff]  ;;  %v319_v39 = vld [vmem:[%s1685_s25 + $0x128] sm:$0xff]  ;;  %v336_v42 = vld [vmem:[%s1685_s25 + $0x1b0] sm:$0xff]  ;;  %v1352_v44 = vpack.c.bf16 %v287_v37, %v286_v36  ;;  %v1355_v46 = vpack.c.bf16 %v305_v41, %v304_v40 }
  0x25   : > { %v337_v43 = vld [vmem:[%s1685_s25 + $0x1b8] sm:$0xff]  ;;  %v1400_v45 = vpack.c.bf16 %v319_v39, %v318_v38  ;;  %v288_v48 = vld [vmem:[%s1685_s25 + $0x30] sm:$0xff]  ;;  %v306_v52 = vld [vmem:[%s1685_s25 + $0xc0] sm:$0xff]  ;;  %p1516_p3 = pnand %p1515_p2, %p1509_p13 }
  0x26   : > { %v1403_v47 = vpack.c.bf16 %v337_v43, %v336_v42  ;;  %v289_v49 = vld [vmem:[%s1685_s25 + $0x38] sm:$0xff]  ;;  %v320_v50 = vld [vmem:[%s1685_s25 + $0x130] sm:$0xff]  ;;  %v307_v53 = vld [vmem:[%s1685_s25 + $0xc8] sm:$0xff] }
  0x27   : > { %v321_v51 = vld [vmem:[%s1685_s25 + $0x138] sm:$0xff]  ;;  %v338_v54 = vld [vmem:[%s1685_s25 + $0x1c0] sm:$0xff]  ;;  %v339_v55 = vld [vmem:[%s1685_s25 + $0x1c8] sm:$0xff]  ;;  %v1358_v56 = vpack.c.bf16 %v289_v49, %v288_v48  ;;  %v1361_v58 = vpack.c.bf16 %v307_v53, %v306_v52 }
  0x28   : > { %v1406_v57 = vpack.c.bf16 %v321_v51, %v320_v50  ;;  %v1409_v59 = vpack.c.bf16 %v339_v55, %v338_v54  ;;  %v290_v60 = vld [vmem:[%s1685_s25 + $0x40] sm:$0xff]  ;;  %v291_v61 = vld [vmem:[%s1685_s25 + $0x48] sm:$0xff]  ;;  %v308_v0 = vld [vmem:[%s1685_s25 + $0xd0] sm:$0xff] }
  0x29   : > { %1348 = vmatpush3.bf16.xpose.msk.msra.mxu0 %vm1689_vm1, %v1346_v32  ;;  %v322_v62 = vld [vmem:[%s1685_s25 + $0x140] sm:$0xff]  ;;  %v323_v63 = vld [vmem:[%s1685_s25 + $0x148] sm:$0xff]  ;;  %v309_v2 = vld [vmem:[%s1685_s25 + $0xd8] sm:$0xff]  ;;  %v1364_v6 = vpack.c.bf16 %v291_v61, %v290_v60 }
  0x2a   : > { %1396 = vmatpush3.bf16.xpose.msk.msra.mxu1 %vm1689_vm1, %v1394_v33  ;;  %1351 = vmatprep.subr.msk.bf16.mxu0 %vm1689_vm1, %v1349_v34  ;;  %v340_v3 = vld [vmem:[%s1685_s25 + $0x1d0] sm:$0xff]  ;;  %v341_v4 = vld [vmem:[%s1685_s25 + $0x1d8] sm:$0xff]  ;;  %v1412_v7 = vpack.c.bf16 %v323_v63, %v322_v62  ;;  %v1367_v8 = vpack.c.bf16 %v309_v2, %v308_v0  ;;  %v310_v14 = vld [vmem:[%s1685_s25 + $0xe0] sm:$0xff] }
  0x2b   : > { %1399 = vmatprep.subr.msk.bf16.mxu1 %vm1689_vm1, %v1397_v35  ;;  %v1415_v9 = vpack.c.bf16 %v341_v4, %v340_v3  ;;  %v292_v10 = vld [vmem:[%s1685_s25 + $0x50] sm:$0xff]  ;;  %v293_v11 = vld [vmem:[%s1685_s25 + $0x58] sm:$0xff]  ;;  %v311_v15 = vld [vmem:[%s1685_s25 + $0xe8] sm:$0xff] }
  0x2c   : > { %v324_v12 = vld [vmem:[%s1685_s25 + $0x150] sm:$0xff]  ;;  %v325_v13 = vld [vmem:[%s1685_s25 + $0x158] sm:$0xff]  ;;  %v342_v16 = vld [vmem:[%s1685_s25 + $0x1e0] sm:$0xff]  ;;  %v1370_v18 = vpack.c.bf16 %v293_v11, %v292_v10  ;;  %v1373_v20 = vpack.c.bf16 %v311_v15, %v310_v14 }
  0x2d   : > { %v343_v17 = vld [vmem:[%s1685_s25 + $0x1e8] sm:$0xff]  ;;  %v1418_v19 = vpack.c.bf16 %v325_v13, %v324_v12  ;;  %v294_v22 = vld [vmem:[%s1685_s25 + $0x60] sm:$0xff]  ;;  %v312_v26 = vld [vmem:[%s1685_s25 + $0xf0] sm:$0xff] }
  0x2e   : > { %v1421_v21 = vpack.c.bf16 %v343_v17, %v342_v16  ;;  %v295_v23 = vld [vmem:[%s1685_s25 + $0x68] sm:$0xff]  ;;  %v326_v24 = vld [vmem:[%s1685_s25 + $0x160] sm:$0xff]  ;;  %v313_v27 = vld [vmem:[%s1685_s25 + $0xf8] sm:$0xff] }
  0x2f   : > { %v327_v25 = vld [vmem:[%s1685_s25 + $0x168] sm:$0xff]  ;;  %v344_v28 = vld [vmem:[%s1685_s25 + $0x1f0] sm:$0xff]  ;;  %v345_v29 = vld [vmem:[%s1685_s25 + $0x1f8] sm:$0xff]  ;;  %v1376_v30 = vpack.c.bf16 %v295_v23, %v294_v22  ;;  %v1379_v32 = vpack.c.bf16 %v313_v27, %v312_v26 }
  0x30   : > { %v1424_v31 = vpack.c.bf16 %v327_v25, %v326_v24  ;;  %v1427_v33 = vpack.c.bf16 %v345_v29, %v344_v28  ;;  %v296_v34 = vld [vmem:[%s1685_s25 + $0x70] sm:$0xff]  ;;  %v297_v35 = vld [vmem:[%s1685_s25 + $0x78] sm:$0xff]  ;;  %v347_v40 = vld [vmem:[%s1889_s1 + $0x8] sm:$0x7f]  ;;  %v898_v25 = vlaneseq }
  0x31   : > { %1354 = vmatpush3.bf16.xpose.msk.msra.mxu0 %vm1689_vm1, %v1352_v44  ;;  %v328_v36 = vld [vmem:[%s1685_s25 + $0x170] sm:$0xff]  ;;  %v329_v37 = vld [vmem:[%s1685_s25 + $0x178] sm:$0xff]  ;;  %v1382_v38 = vpack.c.bf16 %v297_v35, %v296_v34  ;;  %v722_v41 = vld [vmem:[%s1892_s4] sm:$0xff]  ;;  %s1846_s25 = scalar_lea.hbm %s1895_s7, %s1663_s14 }
  0x32   : > { %1402 = vmatpush3.bf16.xpose.msk.msra.mxu1 %vm1689_vm1, %v1400_v45  ;;  %1357 = vmatprep.subr.msk.bf16.mxu0 %vm1689_vm1, %v1355_v46  ;;  %v1430_v39 = vpack.c.bf16 %v329_v37, %v328_v36  ;;  %v892_v42 = vld [vmem:[#allocation2] sm:$0x1]  ;;  %v899_v26 = vshrl.u32 %v898_v25, 7  ;;  %vm1099_vm7 = vcmp.lt.s32.totalorder %v898_v25, 512 }
  0x33   : > { %1405 = vmatprep.subr.msk.bf16.mxu1 %vm1689_vm1, %v1403_v47  ;;  %725 = vperm.xlu1 %1489, %v722_v41   ;;  %v721_v10 = vld [vmem:[%s1891_s3] sm:$0xff] }
  0x34   : > { %v891_v23 = vld [vmem:[%s1893_s5] sm:$0x1]  ;;  %v900_v27 = vsub.s32 0, %v899_v26 }
  0x37   : > { %895 = vperm.xlu1 %1489, %v892_v42  }
  0x39   : > { %1360 = vmatpush3.bf16.xpose.msk.msra.mxu0 %vm1689_vm1, %v1358_v56 }
  0x3a   : > { %1408 = vmatpush3.bf16.xpose.msk.msra.mxu1 %vm1689_vm1, %v1406_v57  ;;  %1363 = vmatprep.subr.msk.bf16.mxu0 %vm1689_vm1, %v1361_v58 }
  0x3b   : > { %1411 = vmatprep.subr.msk.bf16.mxu1 %vm1689_vm1, %v1409_v59 }
  0x41   : > { %1366 = vmatpush3.bf16.xpose.msk.msra.mxu0 %vm1689_vm1, %v1364_v6 }
  0x42   : > { %1414 = vmatpush3.bf16.xpose.msk.msra.mxu1 %vm1689_vm1, %v1412_v7  ;;  %1369 = vmatprep.subr.msk.bf16.mxu0 %vm1689_vm1, %v1367_v8 }
  0x43   : > { %1417 = vmatprep.subr.msk.bf16.mxu1 %vm1689_vm1, %v1415_v9 }
  0x49   : > { %1372 = vmatpush3.bf16.xpose.msk.msra.mxu0 %vm1689_vm1, %v1370_v18 }
  0x4a   : > { %1420 = vmatpush3.bf16.xpose.msk.msra.mxu1 %vm1689_vm1, %v1418_v19  ;;  %1375 = vmatprep.subr.msk.bf16.mxu0 %vm1689_vm1, %v1373_v20 }
  0x4b   : > { %1423 = vmatprep.subr.msk.bf16.mxu1 %vm1689_vm1, %v1421_v21 }
  0x51   : > { %1378 = vmatpush3.bf16.xpose.msk.msra.mxu0 %vm1689_vm1, %v1376_v30 }
  0x52   : > { %1426 = vmatpush3.bf16.xpose.msk.msra.mxu1 %vm1689_vm1, %v1424_v31  ;;  %1381 = vmatprep.subr.msk.bf16.mxu0 %vm1689_vm1, %v1379_v32 }
  0x53   : > { %1429 = vmatprep.subr.msk.bf16.mxu1 %vm1689_vm1, %v1427_v33 }
  0x59   : > { %1384 = vmatpush3.bf16.xpose.msk.msra.mxu0 %vm1689_vm1, %v1382_v38 }
  0x5a   : > { %1432 = vmatpush3.bf16.xpose.msk.msra.mxu1 %vm1689_vm1, %v1430_v39 }
  0x60   : > { %1298 = vmatmul.mubr.msk.f32.vlgmr.msra.gmra.mrb[0].mxu0 %vm360_vm0, %v1668_v1 }
  0x61   : > { %1334 = vmatmul.mubr.msk.f32.vlgmr.msra.gmra.mrb[0].mxu1 %vm360_vm0, %v1668_v1  ;;  %1299 = vmatprep.mubr.msk.f32.mxu0 %vm360_vm0, %v347_v40 }
  0x62   : > { %1335 = vmatprep.mubr.msk.f32.mxu1 %vm360_vm0, %v347_v40 }
  0x64   : > { %1300 = vmatmul.mubr.msk.f32.gmra.mrb[2].mxu0 %vm360_vm0, %v347_v40 }
  0x65   : > { %1336 = vmatmul.mubr.msk.f32.gmra.mrb[2].mxu1 %vm360_vm0, %v347_v40  ;;  %809 = vmatprep.mubr.f32.mxu0 %v1571_v5 }
  0x66   : > { %880 = vmatprep.mubr.f32.mxu1 %v1571_v5 }
  0x92   : > { %v353_v43 = vpop.permute.xlu0 %352 }
  0x96   : > { %v358_v49 = vpop.permute.xlu0 %357 }
  0xb2   : > { %v726_v11 = vpop.permute.xlu1 %725 }
  0xb6   : > { %v896_v28 = vpop.permute.xlu1 %895 }
  0xb7   : > { %v901_v29 = vrot.slane %v896_v28, %v900_v27 }
 0x133   : > { %v625_v1 = vpop.f32.mrb[0].mxu0 }
 0x134   : > { %v702_v44 = vpop.f32.mrb[0].mxu1  ;;  %v627_v45 = vpop.f32.mrb[1].mxu0  ;;  %v626_v47 = vadd.f32 %v625_v1, %v353_v43 }
 0x135   : > { %v704_v46 = vpop.f32.mrb[1].mxu1  ;;  %v703_v48 = vadd.f32 %v702_v44, %v353_v43  ;;  %v628_v50 = vadd.f32 %v627_v45, %v353_v43 }
 0x136   : > { %v705_v52 = vadd.f32 %v704_v46, %v353_v43  ;;  %v713_v59 = vmax.f32 %v626_v47, 0.0 }
 0x137   : > { %v631_v51 = vpop.f32.mrb[2].mxu0  ;;  %v715_v62 = vmax.f32 %v703_v48, 0.0  ;;  %v714_v63 = vmax.f32 %v628_v50, 0.0 }
 0x138   : > { %v632_v53 = vadd.f32 %v631_v51, %v358_v49  ;;  %v708_v54 = vpop.f32.mrb[2].mxu1  ;;  %v633_v55 = vpop.f32.mrb[3].mxu0  ;;  %v716_v3 = vmax.f32 %v705_v52, 0.0  ;;  %v1573_v52 = vmov 1966171168  }
 0x139   : > { %v709_v56 = vadd.f32 %v708_v54, %v358_v49  ;;  %v634_v57 = vadd.f32 %v633_v55, %v358_v49  ;;  %v710_v58 = vpop.f32.mrb[3].mxu1 }
 0x13a   : > { %v717_v60 = vmax.f32 %v632_v53, 0.0  ;;  %v711_v61 = vadd.f32 %v710_v58, %v358_v49  ;;  %v1075_v53 = vunpack.c.l.s4 %v1573_v52 }
 0x13b   : > { %v719_v0 = vmax.f32 %v709_v56, 0.0  ;;  %v718_v2 = vmax.f32 %v634_v57, 0.0 }
 0x13c   : > { %v1436_v4 = vpack.c.bf16 %v717_v60, %v713_v59  ;;  %v720_v6 = vmax.f32 %v711_v61, 0.0  ;;  %v1076_v54 = vunpack.c.0.s8 %v1075_v53 }
 0x13d   : > { %v1442_v7 = vpack.c.bf16 %v719_v0, %v715_v62  ;;  %v1433_v8 = vpack.c.bf16 %v718_v2, %v714_v63 }
 0x13e   : > { %v1439_v9 = vpack.c.bf16 %v720_v6, %v716_v3  ;;  %v1079_v57 = vsub.s32 %v1076_v54, %v899_v26 }
 0x13f   : > { %1435 = vmatprep.subr.msk.bf16.mxu0 %vm1434_vm4, %v1433_v8 }
 0x140   : > { %1441 = vmatprep.subr.msk.bf16.mxu1 %vm1434_vm4, %v1439_v9  ;;  %1438 = vmatpush1.bf16.msk.msra.mxu0 %vm1434_vm4, %v1436_v4 }
 0x141   : > { %1444 = vmatpush1.bf16.msk.msra.mxu1 %vm1434_vm4, %v1442_v7 }
 0x143   : > { %1253 = vmatmul.mubr.msk.f32.vlgmr.msra.gmra.mrb[4].mxu0 %vm728_vm5, %v721_v10 }
 0x144   : > { %1256 = vmatmul.mubr.msk.f32.vlgmr.msra.gmra.mrb[4].mxu1 %vm728_vm5, %v721_v10  ;;  %970 = vmatprep.mubr.f32.mxu0 %v1571_v5 }
 0x145   : > { %1041 = vmatprep.mubr.f32.mxu1 %v1571_v5 }
 0x216   : > { %v811_v12 = vpop.f32.mrb[4].mxu0 }
 0x217   : > { %v812_v13 = vadd.f32 %v811_v12, %v726_v11  ;;  %v882_v14 = vpop.f32.mrb[4].mxu1  ;;  %v813_v15 = vpop.f32.mrb[5].mxu0 }
 0x218   : > { %v883_v16 = vadd.f32 %v882_v14, %v726_v11  ;;  %v814_v17 = vadd.f32 %v813_v15, %v726_v11  ;;  %v884_v18 = vpop.f32.mrb[5].mxu1 }
 0x219   : > { %v885_v19 = vadd.f32 %v884_v18, %v726_v11  ;;  %v887_v21 = vmax.f32 %v812_v13, 0.0 }
 0x21a   : > { %v888_v20 = vmax.f32 %v814_v17, 0.0  ;;  %v889_v24 = vmax.f32 %v883_v16, 0.0 }
 0x21b   : > { %v890_v22 = vmax.f32 %v885_v19, 0.0 }
 0x21c   : > { %906 = vmatprep.subr.mxu0 %v888_v20 }
 0x21d   : > { %977 = vmatprep.subr.mxu1 %v890_v22  ;;  %907 = vmatpush1.msra.mxu0 %v887_v21 }
 0x21e   : > { %978 = vmatpush1.msra.mxu1 %v889_v24  ;;  %1257 = vmatmul.mubr.msk.f32.vlgmr.msra.gmra.mrb[6].mxu0 %vm902_vm6, %v891_v23 }
 0x21f   : > { %1258 = vmatmul.mubr.msk.f32.vlgmr.msra.gmra.mrb[6].mxu1 %vm902_vm6, %v891_v23 }
 0x2f1   : > { %v972_v30 = vpop.f32.mrb[6].mxu0 }
 0x2f2   : > { %v973_v31 = vadd.f32 %v972_v30, %v901_v29  ;;  %v1043_v32 = vpop.f32.mrb[6].mxu1  ;;  %v974_v33 = vpop.f32.mrb[7].mxu0 }
 0x2f3   : > { %v1044_v34 = vadd.f32 %v1043_v32, %v901_v29  ;;  %v975_v35 = vadd.f32 %v974_v33, %v901_v29  ;;  %v1045_v36 = vpop.f32.mrb[7].mxu1 }
 0x2f4   : > { %v1048_v37 = vsub.f32 0.0, %v973_v31  ;;  %v1046_v38 = vadd.f32 %v1045_v36, %v901_v29 }
 0x2f5   : > { %v1050_v39 = vsub.f32 0.0, %v1044_v34  ;;  %v1049_v40 = vsub.f32 0.0, %v975_v35 }
 0x2f6   : > { %v1052_v5 = vmul.f32 1.442695, %v1048_v37  ;;  %v1051_v41 = vsub.f32 0.0, %v1046_v38 }
 0x2f7   : > { %v1056_v42 = vmul.f32 1.442695, %v1050_v39  ;;  %v1054_v43 = vmul.f32 1.442695, %v1049_v40 }
 0x2f8   : > { %1490 = vpow2.f32 %v1052_v5  ;;  %v1058_v1 = vmul.f32 1.442695, %v1051_v41 }
 0x2f9   : > { %1492 = vpow2.f32 %v1056_v42 }
 0x2fa   : > { %1494 = vpow2.f32 %v1054_v43 }
 0x2fb   : > { %1496 = vpow2.f32 %v1058_v1 }
 0x302   : > { %v1491_v44 = vpop.eup %1490 }
 0x303   : > { %v1493_v45 = vpop.eup %1492  ;;  %v1060_v46 = vadd.f32 1.0, %v1491_v44 }
 0x304   : > { %v1495_v47 = vpop.eup %1494  ;;  %v1062_v48 = vadd.f32 1.0, %v1493_v45 }
 0x305   : > { %v1497_v49 = vpop.eup %1496  ;;  %1498 = vrcp.f32 %v1060_v46  ;;  %v1061_v50 = vadd.f32 1.0, %v1495_v47 }
 0x306   : > { %1500 = vrcp.f32 %v1062_v48  ;;  %v1063_v51 = vadd.f32 1.0, %v1497_v49 }
 0x307   : > { %1502 = vrcp.f32 %v1061_v50 }
 0x308   : > { %1504 = vrcp.f32 %v1063_v51 }
 0x30f   : > { %v1499_v55 = vpop.eup %1498 }
 0x310   : > { %v1501_v56 = vpop.eup %1500 }
 0x311   : > { %v1503_v58 = vpop.eup %1502 }
 0x312   : > { %v1505_v59 = vpop.eup %1504  ;;  %v1072_v60 = vcombine.low %v1499_v55, %v1503_v58 }
 0x313   : > { %v1073_v61 = vcombine.low %v1501_v56, %v1505_v59 }
 0x314   : > { %v1080_v62 = vrot.slane %v1072_v60, %v1079_v57 }
 0x315   : > { %v1087_v63 = vrot.slane %v1073_v61, %v1079_v57 }
 0x317   : > { %v1088_v0 = vcombine.low %v1080_v62, %v1087_v63 }
 0x319   : > { %v1095_v2 = vrot.slane %v1088_v0, %v1079_v57 }
 0x31b   : > { %1101 = vst.msk [vmem:[%s274_s21] sm:$0xf] %vm1099_vm7, %v1095_v2 }
 0x31c   : > { %1519 = shalt.err (!%p1516_p3)
}
 0x31d   : > { %s1520_s14 = scalar_lea.hbm %s1846_s25, 64  ;;  %s1524_s18 = scalar_lea.hbm %s1895_s7, 512 }
 0x31e   : > { %p1521_p4 = scmp.ne.s32.totalorder %s1846_s25, %s1520_s14  ;;  %p1525_p9 = scmp.lt.u32.totalorder %s1846_s25, %s1895_s7 }
 0x31f   : > { %p1526_p10 = scmp.lt.u32.totalorder %s1524_s18, %s1520_s14  ;;  %p1528_p12 = scmp.lt.u32.totalorder %s1520_s14, %s1846_s25 }
 0x320   : > { %p1522_p7 = pnand %p1521_p4, %p1653_p5 }
 0x321   : > { %p1527_p11 = por %p1526_p10, %p1525_p9 }
 0x322   : > { %p1523_p8 = pneg %p1522_p7 }
 0x323   : > { %p1529_p13 = por %p1528_p12, %p1527_p11 }
 0x325   : > { %p1530_p0 = pnand %p1529_p13, %p1523_p8 }
 0x327   : > { %1533 = shalt.err (!%p1530_p0)
}
 0x328   : > { %1445 = dma.vmem_to_hbm [thread:$0]  (%p1653_p5), %s1848_s22, 64, %s1846_s25, %s1103_s6  }
 0x329 PF: > { %p1451_p1 = scmp.ge.s32.totalorder %s1568_s29, 2  ;;  %s1129_s21 = sand.u32 1, %s1556_s26  }
 0x32a   : > { %s1130_s23 = scalar_lea.sflag [#allocation4], %s1129_s21 }
 0x32b   : > { %p1448_p2 = pnand %p1451_p1, %p1657_p6 }
 0x32d   : > { %1551 = dma.done.wait (!%p1448_p2), %s1130_s23, 64  }
 0x32e   : > { %1553 = vsyncadd (!%p1448_p2), %s1130_s23, 4294967232  ;;  %p19_p3 = scmp.ge.s32.totalorder %s1641_s8, 10   ;;  %s1900_s26 = smov %s1560_s27 }
 0x32f   : > { %s1901_s27 = smov %s1564_s28  ;;  %s1902_s28 = smov %s1651_s11 }
 0x330   : > { %s1903_s29 = smov %s1641_s8  ;;  %21 = sbr.rel (!%p19_p3) target bundleno = 6 (0x6), region = 83 }
 0x337   :  { %1135 = vsyncpa [#allocation4], 1 }
 0x338   :  { %1137 = vsyncpa [#allocation4 + $0x1], 1 }

</bundles_post_ra>
